<compile_context>
chip_gen: v5e
topology: v5e:2x2
jax: 0.10.0
libtpu: 0.0.40
codegen_flags: <defaults>
</compile_context>

<pallas_src>
import jax
import jax.numpy as jnp
from jax.experimental import pallas as pl
from jax.experimental.pallas import tpu as pltpu


# ----------------------------------------------------------------------------
# Pallas kernel: unrolled LSTM recurrence (fused gate matmul) + batched output
# projection, all in one invocation (no grid).
# ----------------------------------------------------------------------------
def _char_decoder_kernel(
    xw_ref,       # (L*Bp, 4H)  pre-projected inputs: emb(x) @ W_ih + b (gate order i,f,g,o)
    h0_ref,       # (Bp, H)     initial hidden state (batch padded to sublane multiple)
    c0_ref,       # (Bp, H)     initial cell state
    whh_ref,      # (H, 4H)     fused recurrent weights (gate order i,f,g,o)
    wproj_ref,    # (H, Vp)     output projection weight (V zero-padded to Vp)
    bproj_ref,    # (1, Vp)     output projection bias   (zero-padded)
    scores_ref,   # (L*Bp, Vp)  output scores (lane-dense)
    hN_ref,       # (Bp, H)     final hidden state
    cN_ref,       # (Bp, H)     final cell state
    h_all,        # VMEM scratch (L*Bp, H): hidden states of every timestep
):
    Bp, H = h0_ref.shape
    LBp = xw_ref.shape[0]
    L = LBp // Bp

    h = h0_ref[...]                                        # (Bp, H)
    c = c0_ref[...]                                        # (Bp, H)

    # Serial LSTM recurrence, fully unrolled (L is small and static).
    # One fused lane-dense (Bp, 4H) MXU matmul per step; RHS read from VMEM
    # inside the loop (short live range).
    for t in range(L):
        lo = t * Bp                                        # sublane-aligned (Bp = 8k)
        pre = xw_ref[lo:lo + Bp, :] + jnp.dot(
            h, whh_ref[...], preferred_element_type=jnp.float32)   # (Bp, 4H)
        # One full-vreg sigmoid over all gate lanes; gates then extracted with
        # static 32-lane slices (gate order i, f, g, o along the 4H axis).
        sig = jax.nn.sigmoid(pre)
        i_g = sig[:, 0 * H:1 * H]
        f_g = sig[:, 1 * H:2 * H]
        o_g = sig[:, 3 * H:4 * H]
        g_g = jnp.tanh(pre[:, 2 * H:3 * H])
        c = f_g * c + i_g * g_g
        h = o_g * jnp.tanh(c)
        h_all[lo:lo + Bp, :] = h                           # full-tile, unmasked store

    # Final LSTM state: written exactly once.
    hN_ref[...] = h
    cN_ref[...] = c

    # Batched vocab projection over all L*Bp rows -> lane-dense (L*Bp, Vp) store.
    scores_ref[...] = (
        jnp.dot(h_all[...], wproj_ref[...], preferred_element_type=jnp.float32)
        + bproj_ref[...]
    ).astype(scores_ref.dtype)


# ----------------------------------------------------------------------------
# Wrapper: embedding+input-projection folding (glue), padding, pallas_call.
# ----------------------------------------------------------------------------
@jax.jit
def char_decoder_forward(tokens, params, dec_hidden=None):
    """Equivalent of CharDecoder.forward.

    tokens:     (L, B) int32
    dec_hidden: optional tuple of (1, B, H) float32 tensors
    returns:    scores (L, B, V), (h_n, c_n) each (1, B, H)
    """
    emb_table = params["emb"]          # (V, E)  (padding row already zeroed)
    w_ih_t = params["w_ih_t"]          # (E, 4H)
    w_hh_t = params["w_hh_t"]          # (H, 4H)
    b_lstm = params["b_lstm"]          # (1, 4H)  = b_ih + b_hh
    w_proj_t = params["w_proj_t"]      # (H, V)
    b_proj = params["b_proj"]          # (1, V)

    L, B = tokens.shape
    H = w_hh_t.shape[0]
    V = w_proj_t.shape[1]
    Vp = ((V + 127) // 128) * 128      # pad vocab dim to a 128-lane multiple
    Bp = ((B + 7) // 8) * 8            # pad batch to a full sublane tile

    # Fold embedding + input projection + combined bias into a tiny (V, 4H)
    # lookup table (parameter-only), then gather per token. The kernel never
    # sees the ragged E-wide embeddings or W_ih.
    xw_table = emb_table @ w_ih_t + b_lstm                 # (V, 4H)
    xw = jnp.take(xw_table, tokens, axis=0)                # (L, B, 4H)
    xw = jnp.pad(xw, ((0, 0), (0, Bp - B), (0, 0))).reshape(L * Bp, 4 * H)

    if dec_hidden is None:
        h0 = jnp.zeros((Bp, H), jnp.float32)
        c0 = jnp.zeros((Bp, H), jnp.float32)
    else:
        h0 = jnp.pad(dec_hidden[0][0], ((0, Bp - B), (0, 0)))
        c0 = jnp.pad(dec_hidden[1][0], ((0, Bp - B), (0, 0)))

    # Zero-pad vocab dim for lane-dense score stores; sliced off after the call.
    w_proj_p = jnp.pad(w_proj_t, ((0, 0), (0, Vp - V)))
    b_proj_p = jnp.pad(b_proj, ((0, 0), (0, Vp - V)))

    vmem = pl.BlockSpec(memory_space=pltpu.MemorySpace.VMEM)

    flops = 2 * L * Bp * H * (4 * H) + 2 * (L * Bp) * H * Vp
    transcendentals = L * Bp * (4 * H + 2 * H)
    bytes_accessed = 4 * (L * Bp * 4 * H + 2 * Bp * H + H * 4 * H
                          + H * Vp + Vp + L * Bp * Vp + 2 * Bp * H)

    scores2d, h_n, c_n = pl.pallas_call(
        _char_decoder_kernel,
        out_shape=(
            jax.ShapeDtypeStruct((L * Bp, Vp), jnp.float32),
            jax.ShapeDtypeStruct((Bp, H), jnp.float32),
            jax.ShapeDtypeStruct((Bp, H), jnp.float32),
        ),
        in_specs=[vmem] * 6,
        out_specs=(vmem, vmem, vmem),
        scratch_shapes=[pltpu.VMEM((L * Bp, H), jnp.float32)],
        cost_estimate=pl.CostEstimate(
            flops=flops,
            transcendentals=transcendentals,
            bytes_accessed=bytes_accessed,
        ),
    )(xw, h0, c0, w_hh_t, w_proj_p, b_proj_p)

    # Drop batch + vocab padding BEFORE anything downstream (softmax/loss).
    scores = scores2d.reshape(L, Bp, Vp)[:, :B, :V]
    return scores, (h_n[:B][None], c_n[:B][None])


# ----------------------------------------------------------------------------
# Pure-JAX reference (for a correctness sanity check).
# ----------------------------------------------------------------------------
def char_decoder_forward_ref(tokens, params, dec_hidden=None):
    emb_table = params["emb"]
    w_ih_t, w_hh_t, b_lstm = params["w_ih_t"], params["w_hh_t"], params["b_lstm"]
    w_proj_t, b_proj = params["w_proj_t"], params["b_proj"]
    L, B = tokens.shape
    H = w_hh_t.shape[0]
    x = jnp.take(emb_table, tokens, axis=0)
    if dec_hidden is None:
        h = jnp.zeros((B, H), jnp.float32)
        c = jnp.zeros((B, H), jnp.float32)
    else:
        h, c = dec_hidden[0][0], dec_hidden[1][0]

    def step(carry, x_t):
        h, c = carry
        g = x_t @ w_ih_t + h @ w_hh_t + b_lstm[0]
        i = jax.nn.sigmoid(g[:, 0 * H:1 * H])
        f = jax.nn.sigmoid(g[:, 1 * H:2 * H])
        gg = jnp.tanh(g[:, 2 * H:3 * H])
        o = jax.nn.sigmoid(g[:, 3 * H:4 * H])
        c = f * c + i * gg
        h = o * jnp.tanh(c)
        return (h, c), h @ w_proj_t + b_proj[0]

    (h, c), scores = jax.lax.scan(step, (h, c), x)
    return scores, (h[None], c[None])


# ----------------------------------------------------------------------------
# Deterministic parameter init + demo run.
# ----------------------------------------------------------------------------
def make_params(key, vocab_size, char_emb_size, hidden_size, pad_idx):
    ks = jax.random.split(key, 7)
    scale = 0.1
    emb = scale * jax.random.normal(ks[0], (vocab_size, char_emb_size), jnp.float32)
    emb = emb.at[pad_idx].set(0.0)  # nn.Embedding padding_idx row is zero
    w_ih_t = scale * jax.random.normal(ks[1], (char_emb_size, 4 * hidden_size), jnp.float32)
    w_hh_t = scale * jax.random.normal(ks[2], (hidden_size, 4 * hidden_size), jnp.float32)
    b_ih = scale * jax.random.normal(ks[3], (4 * hidden_size,), jnp.float32)
    b_hh = scale * jax.random.normal(ks[4], (4 * hidden_size,), jnp.float32)
    w_proj_t = scale * jax.random.normal(ks[5], (hidden_size, vocab_size), jnp.float32)
    b_proj = scale * jax.random.normal(ks[6], (vocab_size,), jnp.float32)
    return {
        "emb": emb,
        "w_ih_t": w_ih_t,
        "w_hh_t": w_hh_t,
        "b_lstm": (b_ih + b_hh)[None, :],   # PyTorch adds both biases
        "w_proj_t": w_proj_t,
        "b_proj": b_proj[None, :],
    }


if __name__ == "__main__":
    # Small shapes consistent with the module: char vocab, char embeddings, LSTM hidden.
    LENGTH, BATCH = 8, 2
    HIDDEN = 32
    CHAR_EMB = 50            # module default char_embedding_size
    VOCAB = 30               # len(target_vocab.char2id)
    PAD_IDX = 0              # target_vocab.char2id['<pad>']

    key = jax.random.PRNGKey(0)
    k_tok, k_par, k_h, k_c = jax.random.split(key, 4)

    tokens = jax.random.randint(k_tok, (LENGTH, BATCH), 0, VOCAB, dtype=jnp.int32)
    params = make_params(k_par, VOCAB, CHAR_EMB, HIDDEN, PAD_IDX)
    dec_hidden = (
        0.1 * jax.random.normal(k_h, (1, BATCH, HIDDEN), jnp.float32),
        0.1 * jax.random.normal(k_c, (1, BATCH, HIDDEN), jnp.float32),
    )

    scores, (h_n, c_n) = char_decoder_forward(tokens, params, dec_hidden)
    jax.block_until_ready((scores, h_n, c_n))

    # Sanity-check against a pure-JAX reference of the same math.
    scores_ref, (h_ref, c_ref) = char_decoder_forward_ref(tokens, params, dec_hidden)
    assert scores.shape == (LENGTH, BATCH, VOCAB)
    assert h_n.shape == (1, BATCH, HIDDEN) and c_n.shape == (1, BATCH, HIDDEN)
    assert jnp.allclose(scores, scores_ref, atol=1e-5, rtol=1e-5)
    assert jnp.allclose(h_n, h_ref, atol=1e-5, rtol=1e-5)
    assert jnp.allclose(c_n, c_ref, atol=1e-5, rtol=1e-5)

    # TODO(synk): train_forward (cross-entropy loss) and decode_greedy (Python-level
    # string assembly) are host-side / loss utilities, not part of the forward kernel.

    print("KERNEL_OK")
</pallas_src>

<mosaic_0001>
module attributes {stable_mosaic.version = 11 : i64} {
  func.func @_char_decoder_kernel(%arg0: memref<64x128xf32, #tpu.memory_space<vmem>>, %arg1: memref<8x32xf32, #tpu.memory_space<vmem>>, %arg2: memref<8x32xf32, #tpu.memory_space<vmem>>, %arg3: memref<32x128xf32, #tpu.memory_space<vmem>>, %arg4: memref<32x128xf32, #tpu.memory_space<vmem>>, %arg5: memref<1x128xf32, #tpu.memory_space<vmem>>, %arg6: memref<64x128xf32, #tpu.memory_space<vmem>>, %arg7: memref<8x32xf32, #tpu.memory_space<vmem>>, %arg8: memref<8x32xf32, #tpu.memory_space<vmem>>, %arg9: memref<64x32xf32, #tpu.memory_space<vmem>>) attributes {dimension_semantics = [], scalar_prefetch = 0 : i64, scratch_operands = 1 : i64, tpu.core_type = #tpu.core_type<tc>} {
    %c0 = arith.constant 0 : index
    %c0_0 = arith.constant 0 : index
    %0 = vector.load %arg1[%c0, %c0_0] : memref<8x32xf32, #tpu.memory_space<vmem>>, vector<8x32xf32>
    %c0_1 = arith.constant 0 : index
    %c0_2 = arith.constant 0 : index
    %1 = vector.load %arg2[%c0_1, %c0_2] : memref<8x32xf32, #tpu.memory_space<vmem>>, vector<8x32xf32>
    %c0_3 = arith.constant 0 : index
    %c0_4 = arith.constant 0 : index
    %2 = vector.load %arg0[%c0_3, %c0_4] : memref<64x128xf32, #tpu.memory_space<vmem>>, vector<8x128xf32>
    %c0_5 = arith.constant 0 : index
    %c0_6 = arith.constant 0 : index
    %3 = vector.load %arg3[%c0_5, %c0_6] : memref<32x128xf32, #tpu.memory_space<vmem>>, vector<32x128xf32>
    %cst = arith.constant dense<0.000000e+00> : vector<8x128xf32>
    %4 = tpu.matmul %0, %3, %cst {dimension_numbers = #tpu.dot_dimension_numbers<[1], [0], [0], [1], [0, 0, 1, 1], [], []>} : vector<8x32xf32>, vector<32x128xf32>, vector<8x128xf32> -> vector<8x128xf32>
    %5 = arith.addf %2, %4 : vector<8x128xf32>
    %6 = arith.negf %5 : vector<8x128xf32>
    %7 = math.exp %6 : vector<8x128xf32>
    %cst_7 = arith.constant 1.000000e+00 : f32
    %8 = vector.broadcast %cst_7 : f32 to vector<8x128xf32>
    %9 = arith.addf %8, %7 : vector<8x128xf32>
    %10 = arith.divf %8, %9 : vector<8x128xf32>
    %11 = vector.extract_strided_slice %10 {offsets = [0, 0], sizes = [8, 32], strides = [1, 1]} : vector<8x128xf32> to vector<8x32xf32>
    %12 = vector.extract_strided_slice %10 {offsets = [0, 32], sizes = [8, 32], strides = [1, 1]} : vector<8x128xf32> to vector<8x32xf32>
    %13 = vector.extract_strided_slice %10 {offsets = [0, 96], sizes = [8, 32], strides = [1, 1]} : vector<8x128xf32> to vector<8x32xf32>
    %14 = vector.extract_strided_slice %5 {offsets = [0, 64], sizes = [8, 32], strides = [1, 1]} : vector<8x128xf32> to vector<8x32xf32>
    %15 = math.tanh %14 : vector<8x32xf32>
    %16 = arith.mulf %12, %1 : vector<8x32xf32>
    %17 = arith.mulf %11, %15 : vector<8x32xf32>
    %18 = arith.addf %16, %17 : vector<8x32xf32>
    %19 = math.tanh %18 : vector<8x32xf32>
    %20 = arith.mulf %13, %19 : vector<8x32xf32>
    %c0_8 = arith.constant 0 : index
    %c0_9 = arith.constant 0 : index
    %21 = vector.load %arg9[%c0_8, %c0_9] : memref<64x32xf32, #tpu.memory_space<vmem>>, vector<8x32xf32>
    tpu.vector_store %arg9[%c0_8, %c0_9], %20 {strides = array<i32>} : memref<64x32xf32, #tpu.memory_space<vmem>>, vector<8x32xf32>,
    %c8 = arith.constant 8 : index
    %c0_10 = arith.constant 0 : index
    %22 = vector.load %arg0[%c8, %c0_10] : memref<64x128xf32, #tpu.memory_space<vmem>>, vector<8x128xf32>
    %c0_11 = arith.constant 0 : index
    %c0_12 = arith.constant 0 : index
    %23 = vector.load %arg3[%c0_11, %c0_12] : memref<32x128xf32, #tpu.memory_space<vmem>>, vector<32x128xf32>
    %cst_13 = arith.constant dense<0.000000e+00> : vector<8x128xf32>
    %24 = tpu.matmul %20, %23, %cst_13 {dimension_numbers = #tpu.dot_dimension_numbers<[1], [0], [0], [1], [0, 0, 1, 1], [], []>} : vector<8x32xf32>, vector<32x128xf32>, vector<8x128xf32> -> vector<8x128xf32>
    %25 = arith.addf %22, %24 : vector<8x128xf32>
    %26 = arith.negf %25 : vector<8x128xf32>
    %27 = math.exp %26 : vector<8x128xf32>
    %cst_14 = arith.constant 1.000000e+00 : f32
    %28 = vector.broadcast %cst_14 : f32 to vector<8x128xf32>
    %29 = arith.addf %28, %27 : vector<8x128xf32>
    %30 = arith.divf %28, %29 : vector<8x128xf32>
    %31 = vector.extract_strided_slice %30 {offsets = [0, 0], sizes = [8, 32], strides = [1, 1]} : vector<8x128xf32> to vector<8x32xf32>
    %32 = vector.extract_strided_slice %30 {offsets = [0, 32], sizes = [8, 32], strides = [1, 1]} : vector<8x128xf32> to vector<8x32xf32>
    %33 = vector.extract_strided_slice %30 {offsets = [0, 96], sizes = [8, 32], strides = [1, 1]} : vector<8x128xf32> to vector<8x32xf32>
    %34 = vector.extract_strided_slice %25 {offsets = [0, 64], sizes = [8, 32], strides = [1, 1]} : vector<8x128xf32> to vector<8x32xf32>
    %35 = math.tanh %34 : vector<8x32xf32>
    %36 = arith.mulf %32, %18 : vector<8x32xf32>
    %37 = arith.mulf %31, %35 : vector<8x32xf32>
    %38 = arith.addf %36, %37 : vector<8x32xf32>
    %39 = math.tanh %38 : vector<8x32xf32>
    %40 = arith.mulf %33, %39 : vector<8x32xf32>
    %c8_15 = arith.constant 8 : index
    %c0_16 = arith.constant 0 : index
    %41 = vector.load %arg9[%c8_15, %c0_16] : memref<64x32xf32, #tpu.memory_space<vmem>>, vector<8x32xf32>
    tpu.vector_store %arg9[%c8_15, %c0_16], %40 {strides = array<i32>} : memref<64x32xf32, #tpu.memory_space<vmem>>, vector<8x32xf32>,
    %c16 = arith.constant 16 : index
    %c0_17 = arith.constant 0 : index
    %42 = vector.load %arg0[%c16, %c0_17] : memref<64x128xf32, #tpu.memory_space<vmem>>, vector<8x128xf32>
    %c0_18 = arith.constant 0 : index
    %c0_19 = arith.constant 0 : index
    %43 = vector.load %arg3[%c0_18, %c0_19] : memref<32x128xf32, #tpu.memory_space<vmem>>, vector<32x128xf32>
    %cst_20 = arith.constant dense<0.000000e+00> : vector<8x128xf32>
    %44 = tpu.matmul %40, %43, %cst_20 {dimension_numbers = #tpu.dot_dimension_numbers<[1], [0], [0], [1], [0, 0, 1, 1], [], []>} : vector<8x32xf32>, vector<32x128xf32>, vector<8x128xf32> -> vector<8x128xf32>
    %45 = arith.addf %42, %44 : vector<8x128xf32>
    %46 = arith.negf %45 : vector<8x128xf32>
    %47 = math.exp %46 : vector<8x128xf32>
    %cst_21 = arith.constant 1.000000e+00 : f32
    %48 = vector.broadcast %cst_21 : f32 to vector<8x128xf32>
    %49 = arith.addf %48, %47 : vector<8x128xf32>
    %50 = arith.divf %48, %49 : vector<8x128xf32>
    %51 = vector.extract_strided_slice %50 {offsets = [0, 0], sizes = [8, 32], strides = [1, 1]} : vector<8x128xf32> to vector<8x32xf32>
    %52 = vector.extract_strided_slice %50 {offsets = [0, 32], sizes = [8, 32], strides = [1, 1]} : vector<8x128xf32> to vector<8x32xf32>
    %53 = vector.extract_strided_slice %50 {offsets = [0, 96], sizes = [8, 32], strides = [1, 1]} : vector<8x128xf32> to vector<8x32xf32>
    %54 = vector.extract_strided_slice %45 {offsets = [0, 64], sizes = [8, 32], strides = [1, 1]} : vector<8x128xf32> to vector<8x32xf32>
    %55 = math.tanh %54 : vector<8x32xf32>
    %56 = arith.mulf %52, %38 : vector<8x32xf32>
    %57 = arith.mulf %51, %55 : vector<8x32xf32>
    %58 = arith.addf %56, %57 : vector<8x32xf32>
    %59 = math.tanh %58 : vector<8x32xf32>
    %60 = arith.mulf %53, %59 : vector<8x32xf32>
    %c16_22 = arith.constant 16 : index
    %c0_23 = arith.constant 0 : index
    %61 = vector.load %arg9[%c16_22, %c0_23] : memref<64x32xf32, #tpu.memory_space<vmem>>, vector<8x32xf32>
    tpu.vector_store %arg9[%c16_22, %c0_23], %60 {strides = array<i32>} : memref<64x32xf32, #tpu.memory_space<vmem>>, vector<8x32xf32>,
    %c24 = arith.constant 24 : index
    %c0_24 = arith.constant 0 : index
    %62 = vector.load %arg0[%c24, %c0_24] : memref<64x128xf32, #tpu.memory_space<vmem>>, vector<8x128xf32>
    %c0_25 = arith.constant 0 : index
    %c0_26 = arith.constant 0 : index
    %63 = vector.load %arg3[%c0_25, %c0_26] : memref<32x128xf32, #tpu.memory_space<vmem>>, vector<32x128xf32>
    %cst_27 = arith.constant dense<0.000000e+00> : vector<8x128xf32>
    %64 = tpu.matmul %60, %63, %cst_27 {dimension_numbers = #tpu.dot_dimension_numbers<[1], [0], [0], [1], [0, 0, 1, 1], [], []>} : vector<8x32xf32>, vector<32x128xf32>, vector<8x128xf32> -> vector<8x128xf32>
    %65 = arith.addf %62, %64 : vector<8x128xf32>
    %66 = arith.negf %65 : vector<8x128xf32>
    %67 = math.exp %66 : vector<8x128xf32>
    %cst_28 = arith.constant 1.000000e+00 : f32
    %68 = vector.broadcast %cst_28 : f32 to vector<8x128xf32>
    %69 = arith.addf %68, %67 : vector<8x128xf32>
    %70 = arith.divf %68, %69 : vector<8x128xf32>
    %71 = vector.extract_strided_slice %70 {offsets = [0, 0], sizes = [8, 32], strides = [1, 1]} : vector<8x128xf32> to vector<8x32xf32>
    %72 = vector.extract_strided_slice %70 {offsets = [0, 32], sizes = [8, 32], strides = [1, 1]} : vector<8x128xf32> to vector<8x32xf32>
    %73 = vector.extract_strided_slice %70 {offsets = [0, 96], sizes = [8, 32], strides = [1, 1]} : vector<8x128xf32> to vector<8x32xf32>
    %74 = vector.extract_strided_slice %65 {offsets = [0, 64], sizes = [8, 32], strides = [1, 1]} : vector<8x128xf32> to vector<8x32xf32>
    %75 = math.tanh %74 : vector<8x32xf32>
    %76 = arith.mulf %72, %58 : vector<8x32xf32>
    %77 = arith.mulf %71, %75 : vector<8x32xf32>
    %78 = arith.addf %76, %77 : vector<8x32xf32>
    %79 = math.tanh %78 : vector<8x32xf32>
    %80 = arith.mulf %73, %79 : vector<8x32xf32>
    %c24_29 = arith.constant 24 : index
    %c0_30 = arith.constant 0 : index
    %81 = vector.load %arg9[%c24_29, %c0_30] : memref<64x32xf32, #tpu.memory_space<vmem>>, vector<8x32xf32>
    tpu.vector_store %arg9[%c24_29, %c0_30], %80 {strides = array<i32>} : memref<64x32xf32, #tpu.memory_space<vmem>>, vector<8x32xf32>,
    %c32 = arith.constant 32 : index
    %c0_31 = arith.constant 0 : index
    %82 = vector.load %arg0[%c32, %c0_31] : memref<64x128xf32, #tpu.memory_space<vmem>>, vector<8x128xf32>
    %c0_32 = arith.constant 0 : index
    %c0_33 = arith.constant 0 : index
    %83 = vector.load %arg3[%c0_32, %c0_33] : memref<32x128xf32, #tpu.memory_space<vmem>>, vector<32x128xf32>
    %cst_34 = arith.constant dense<0.000000e+00> : vector<8x128xf32>
    %84 = tpu.matmul %80, %83, %cst_34 {dimension_numbers = #tpu.dot_dimension_numbers<[1], [0], [0], [1], [0, 0, 1, 1], [], []>} : vector<8x32xf32>, vector<32x128xf32>, vector<8x128xf32> -> vector<8x128xf32>
    %85 = arith.addf %82, %84 : vector<8x128xf32>
    %86 = arith.negf %85 : vector<8x128xf32>
    %87 = math.exp %86 : vector<8x128xf32>
    %cst_35 = arith.constant 1.000000e+00 : f32
    %88 = vector.broadcast %cst_35 : f32 to vector<8x128xf32>
    %89 = arith.addf %88, %87 : vector<8x128xf32>
    %90 = arith.divf %88, %89 : vector<8x128xf32>
    %91 = vector.extract_strided_slice %90 {offsets = [0, 0], sizes = [8, 32], strides = [1, 1]} : vector<8x128xf32> to vector<8x32xf32>
    %92 = vector.extract_strided_slice %90 {offsets = [0, 32], sizes = [8, 32], strides = [1, 1]} : vector<8x128xf32> to vector<8x32xf32>
    %93 = vector.extract_strided_slice %90 {offsets = [0, 96], sizes = [8, 32], strides = [1, 1]} : vector<8x128xf32> to vector<8x32xf32>
    %94 = vector.extract_strided_slice %85 {offsets = [0, 64], sizes = [8, 32], strides = [1, 1]} : vector<8x128xf32> to vector<8x32xf32>
    %95 = math.tanh %94 : vector<8x32xf32>
    %96 = arith.mulf %92, %78 : vector<8x32xf32>
    %97 = arith.mulf %91, %95 : vector<8x32xf32>
    %98 = arith.addf %96, %97 : vector<8x32xf32>
    %99 = math.tanh %98 : vector<8x32xf32>
    %100 = arith.mulf %93, %99 : vector<8x32xf32>
    %c32_36 = arith.constant 32 : index
    %c0_37 = arith.constant 0 : index
    %101 = vector.load %arg9[%c32_36, %c0_37] : memref<64x32xf32, #tpu.memory_space<vmem>>, vector<8x32xf32>
    tpu.vector_store %arg9[%c32_36, %c0_37], %100 {strides = array<i32>} : memref<64x32xf32, #tpu.memory_space<vmem>>, vector<8x32xf32>,
    %c40 = arith.constant 40 : index
    %c0_38 = arith.constant 0 : index
    %102 = vector.load %arg0[%c40, %c0_38] : memref<64x128xf32, #tpu.memory_space<vmem>>, vector<8x128xf32>
    %c0_39 = arith.constant 0 : index
    %c0_40 = arith.constant 0 : index
    %103 = vector.load %arg3[%c0_39, %c0_40] : memref<32x128xf32, #tpu.memory_space<vmem>>, vector<32x128xf32>
    %cst_41 = arith.constant dense<0.000000e+00> : vector<8x128xf32>
    %104 = tpu.matmul %100, %103, %cst_41 {dimension_numbers = #tpu.dot_dimension_numbers<[1], [0], [0], [1], [0, 0, 1, 1], [], []>} : vector<8x32xf32>, vector<32x128xf32>, vector<8x128xf32> -> vector<8x128xf32>
    %105 = arith.addf %102, %104 : vector<8x128xf32>
    %106 = arith.negf %105 : vector<8x128xf32>
    %107 = math.exp %106 : vector<8x128xf32>
    %cst_42 = arith.constant 1.000000e+00 : f32
    %108 = vector.broadcast %cst_42 : f32 to vector<8x128xf32>
    %109 = arith.addf %108, %107 : vector<8x128xf32>
    %110 = arith.divf %108, %109 : vector<8x128xf32>
    %111 = vector.extract_strided_slice %110 {offsets = [0, 0], sizes = [8, 32], strides = [1, 1]} : vector<8x128xf32> to vector<8x32xf32>
    %112 = vector.extract_strided_slice %110 {offsets = [0, 32], sizes = [8, 32], strides = [1, 1]} : vector<8x128xf32> to vector<8x32xf32>
    %113 = vector.extract_strided_slice %110 {offsets = [0, 96], sizes = [8, 32], strides = [1, 1]} : vector<8x128xf32> to vector<8x32xf32>
    %114 = vector.extract_strided_slice %105 {offsets = [0, 64], sizes = [8, 32], strides = [1, 1]} : vector<8x128xf32> to vector<8x32xf32>
    %115 = math.tanh %114 : vector<8x32xf32>
    %116 = arith.mulf %112, %98 : vector<8x32xf32>
    %117 = arith.mulf %111, %115 : vector<8x32xf32>
    %118 = arith.addf %116, %117 : vector<8x32xf32>
    %119 = math.tanh %118 : vector<8x32xf32>
    %120 = arith.mulf %113, %119 : vector<8x32xf32>
    %c40_43 = arith.constant 40 : index
    %c0_44 = arith.constant 0 : index
    %121 = vector.load %arg9[%c40_43, %c0_44] : memref<64x32xf32, #tpu.memory_space<vmem>>, vector<8x32xf32>
    tpu.vector_store %arg9[%c40_43, %c0_44], %120 {strides = array<i32>} : memref<64x32xf32, #tpu.memory_space<vmem>>, vector<8x32xf32>,
    %c48 = arith.constant 48 : index
    %c0_45 = arith.constant 0 : index
    %122 = vector.load %arg0[%c48, %c0_45] : memref<64x128xf32, #tpu.memory_space<vmem>>, vector<8x128xf32>
    %c0_46 = arith.constant 0 : index
    %c0_47 = arith.constant 0 : index
    %123 = vector.load %arg3[%c0_46, %c0_47] : memref<32x128xf32, #tpu.memory_space<vmem>>, vector<32x128xf32>
    %cst_48 = arith.constant dense<0.000000e+00> : vector<8x128xf32>
    %124 = tpu.matmul %120, %123, %cst_48 {dimension_numbers = #tpu.dot_dimension_numbers<[1], [0], [0], [1], [0, 0, 1, 1], [], []>} : vector<8x32xf32>, vector<32x128xf32>, vector<8x128xf32> -> vector<8x128xf32>
    %125 = arith.addf %122, %124 : vector<8x128xf32>
    %126 = arith.negf %125 : vector<8x128xf32>
    %127 = math.exp %126 : vector<8x128xf32>
    %cst_49 = arith.constant 1.000000e+00 : f32
    %128 = vector.broadcast %cst_49 : f32 to vector<8x128xf32>
    %129 = arith.addf %128, %127 : vector<8x128xf32>
    %130 = arith.divf %128, %129 : vector<8x128xf32>
    %131 = vector.extract_strided_slice %130 {offsets = [0, 0], sizes = [8, 32], strides = [1, 1]} : vector<8x128xf32> to vector<8x32xf32>
    %132 = vector.extract_strided_slice %130 {offsets = [0, 32], sizes = [8, 32], strides = [1, 1]} : vector<8x128xf32> to vector<8x32xf32>
    %133 = vector.extract_strided_slice %130 {offsets = [0, 96], sizes = [8, 32], strides = [1, 1]} : vector<8x128xf32> to vector<8x32xf32>
    %134 = vector.extract_strided_slice %125 {offsets = [0, 64], sizes = [8, 32], strides = [1, 1]} : vector<8x128xf32> to vector<8x32xf32>
    %135 = math.tanh %134 : vector<8x32xf32>
    %136 = arith.mulf %132, %118 : vector<8x32xf32>
    %137 = arith.mulf %131, %135 : vector<8x32xf32>
    %138 = arith.addf %136, %137 : vector<8x32xf32>
    %139 = math.tanh %138 : vector<8x32xf32>
    %140 = arith.mulf %133, %139 : vector<8x32xf32>
    %c48_50 = arith.constant 48 : index
    %c0_51 = arith.constant 0 : index
    %141 = vector.load %arg9[%c48_50, %c0_51] : memref<64x32xf32, #tpu.memory_space<vmem>>, vector<8x32xf32>
    tpu.vector_store %arg9[%c48_50, %c0_51], %140 {strides = array<i32>} : memref<64x32xf32, #tpu.memory_space<vmem>>, vector<8x32xf32>,
    %c56 = arith.constant 56 : index
    %c0_52 = arith.constant 0 : index
    %142 = vector.load %arg0[%c56, %c0_52] : memref<64x128xf32, #tpu.memory_space<vmem>>, vector<8x128xf32>
    %c0_53 = arith.constant 0 : index
    %c0_54 = arith.constant 0 : index
    %143 = vector.load %arg3[%c0_53, %c0_54] : memref<32x128xf32, #tpu.memory_space<vmem>>, vector<32x128xf32>
    %cst_55 = arith.constant dense<0.000000e+00> : vector<8x128xf32>
    %144 = tpu.matmul %140, %143, %cst_55 {dimension_numbers = #tpu.dot_dimension_numbers<[1], [0], [0], [1], [0, 0, 1, 1], [], []>} : vector<8x32xf32>, vector<32x128xf32>, vector<8x128xf32> -> vector<8x128xf32>
    %145 = arith.addf %142, %144 : vector<8x128xf32>
    %146 = arith.negf %145 : vector<8x128xf32>
    %147 = math.exp %146 : vector<8x128xf32>
    %cst_56 = arith.constant 1.000000e+00 : f32
    %148 = vector.broadcast %cst_56 : f32 to vector<8x128xf32>
    %149 = arith.addf %148, %147 : vector<8x128xf32>
    %150 = arith.divf %148, %149 : vector<8x128xf32>
    %151 = vector.extract_strided_slice %150 {offsets = [0, 0], sizes = [8, 32], strides = [1, 1]} : vector<8x128xf32> to vector<8x32xf32>
    %152 = vector.extract_strided_slice %150 {offsets = [0, 32], sizes = [8, 32], strides = [1, 1]} : vector<8x128xf32> to vector<8x32xf32>
    %153 = vector.extract_strided_slice %150 {offsets = [0, 96], sizes = [8, 32], strides = [1, 1]} : vector<8x128xf32> to vector<8x32xf32>
    %154 = vector.extract_strided_slice %145 {offsets = [0, 64], sizes = [8, 32], strides = [1, 1]} : vector<8x128xf32> to vector<8x32xf32>
    %155 = math.tanh %154 : vector<8x32xf32>
    %156 = arith.mulf %152, %138 : vector<8x32xf32>
    %157 = arith.mulf %151, %155 : vector<8x32xf32>
    %158 = arith.addf %156, %157 : vector<8x32xf32>
    %159 = math.tanh %158 : vector<8x32xf32>
    %160 = arith.mulf %153, %159 : vector<8x32xf32>
    %c56_57 = arith.constant 56 : index
    %c0_58 = arith.constant 0 : index
    %161 = vector.load %arg9[%c56_57, %c0_58] : memref<64x32xf32, #tpu.memory_space<vmem>>, vector<8x32xf32>
    tpu.vector_store %arg9[%c56_57, %c0_58], %160 {strides = array<i32>} : memref<64x32xf32, #tpu.memory_space<vmem>>, vector<8x32xf32>,
    %c0_59 = arith.constant 0 : index
    %c0_60 = arith.constant 0 : index
    %162 = vector.load %arg7[%c0_59, %c0_60] : memref<8x32xf32, #tpu.memory_space<vmem>>, vector<8x32xf32>
    tpu.vector_store %arg7[%c0_59, %c0_60], %160 {strides = array<i32>} : memref<8x32xf32, #tpu.memory_space<vmem>>, vector<8x32xf32>,
    %c0_61 = arith.constant 0 : index
    %c0_62 = arith.constant 0 : index
    %163 = vector.load %arg8[%c0_61, %c0_62] : memref<8x32xf32, #tpu.memory_space<vmem>>, vector<8x32xf32>
    tpu.vector_store %arg8[%c0_61, %c0_62], %158 {strides = array<i32>} : memref<8x32xf32, #tpu.memory_space<vmem>>, vector<8x32xf32>,
    %c0_63 = arith.constant 0 : index
    %c0_64 = arith.constant 0 : index
    %164 = vector.load %arg9[%c0_63, %c0_64] : memref<64x32xf32, #tpu.memory_space<vmem>>, vector<64x32xf32>
    %c0_65 = arith.constant 0 : index
    %c0_66 = arith.constant 0 : index
    %165 = vector.load %arg4[%c0_65, %c0_66] : memref<32x128xf32, #tpu.memory_space<vmem>>, vector<32x128xf32>
    %cst_67 = arith.constant dense<0.000000e+00> : vector<64x128xf32>
    %166 = tpu.matmul %164, %165, %cst_67 {dimension_numbers = #tpu.dot_dimension_numbers<[1], [0], [0], [1], [0, 0, 1, 1], [], []>} : vector<64x32xf32>, vector<32x128xf32>, vector<64x128xf32> -> vector<64x128xf32>
    %c0_68 = arith.constant 0 : index
    %c0_69 = arith.constant 0 : index
    %167 = vector.load %arg5[%c0_68, %c0_69] : memref<1x128xf32, #tpu.memory_space<vmem>>, vector<1x128xf32>
    %168 = vector.broadcast %167 : vector<1x128xf32> to vector<64x128xf32>
    %169 = arith.addf %166, %168 : vector<64x128xf32>
    %c0_70 = arith.constant 0 : index
    %c0_71 = arith.constant 0 : index
    %170 = vector.load %arg6[%c0_70, %c0_71] : memref<64x128xf32, #tpu.memory_space<vmem>>, vector<64x128xf32>
    tpu.vector_store %arg6[%c0_70, %c0_71], %169 {strides = array<i32>} : memref<64x128xf32, #tpu.memory_space<vmem>>, vector<64x128xf32>,
    return
  }
}

</mosaic_0001>

<bundles_post_ra>
// kernel: char_decoder_forward.1
= control target key start
LH: loop header
LB: loop body
LE: loop exit
PB: predicated region body
PF: predicated region fallthrough
CT: control target
= control target key end

     0   :  { %vm33_vm0 = vcmask 261120   ;;  %s805_s15 = smov 64   ;;  %s806_s18 = smov 32   ;;  %s1013_s3 = inlined_call_operand.vmem [shape: f32[32,128], index: 3, kind: input, shape index: {}]   ;;  %s1014_s1 = inlined_call_operand.vmem [shape: f32[8,32], index: 1, kind: input, shape index: {}]   ;;  %s1015_s0 = inlined_call_operand.vmem [shape: f32[64,128], index: 0, kind: input, shape index: {}]   ;;  %s1016_s2 = inlined_call_operand.vmem [shape: f32[8,32], index: 2, kind: input, shape index: {}]   ;;  %s1017_s4 = inlined_call_operand.vmem [shape: f32[32,128], index: 4, kind: input, shape index: {}]   ;;  %s1018_s5 = inlined_call_operand.vmem [shape: f32[1,128], index: 5, kind: input, shape index: {}]   ;;  %s1019_s6 = inlined_call_operand.vmem [shape: f32[64,128], index: 6, kind: output, shape index: {0}]   ;;  %s1020_s8 = inlined_call_operand.vmem [shape: f32[8,32], index: 8, kind: output, shape index: {2}]   ;;  %s1021_s7 = inlined_call_operand.vmem [shape: f32[8,32], index: 7, kind: output, shape index: {1}]  }
   0x1   :  { %v32_v0 = vld [vmem:[%s1013_s3 + $0x18] sm:$0xff]  ;;  %v31_v1 = vld [vmem:[%s1013_s3 + $0x10] sm:$0xff]  ;;  %v30_v2 = vld [vmem:[%s1013_s3 + $0x8] sm:$0xff] }
   0x2   :  { %49 = vmatpush.msra.mxu0 %v32_v0  ;;  %123 = vmatpush.msra.mxu1 %v32_v0  ;;  %v29_v3 = vld [vmem:[%s1013_s3] sm:$0xff]  ;;  %v104_v33 = vld [vmem:[%s1015_s0 + $0x8] sm:$0xff]  ;;  %v174_v59 = vld [vmem:[%s1015_s0 + $0x10] sm:$0xff] }
   0x3   :  { %193 = vmatpush.msra.mxu2 %v32_v0  ;;  %263 = vmatpush.msra.mxu3 %v32_v0  ;;  %v26_v4 = vld [vmem:[%s1014_s1] sm:$0xff] }
   0x4   :  { %50 = vmatpush.msra.mxu0 %v31_v1  ;;  %124 = vmatpush.msra.mxu1 %v31_v1  ;;  %v28_v5 = vld [vmem:[%s1015_s0] sm:$0xff] }
   0x5   :  { %194 = vmatpush.msra.mxu2 %v31_v1  ;;  %264 = vmatpush.msra.mxu3 %v31_v1  ;;  %v27_v9 = vld [vmem:[%s1016_s2] sm:$0xff] }
   0x6   :  { %51 = vmatpush.msra.mxu0 %v30_v2  ;;  %125 = vmatpush.msra.mxu1 %v30_v2 }
   0x7   :  { %195 = vmatpush.msra.mxu2 %v30_v2  ;;  %265 = vmatpush.msra.mxu3 %v30_v2 }
   0x8   :  { %52 = vmatpush.msra.mxu0 %v29_v3  ;;  %126 = vmatpush.msra.mxu1 %v29_v3 }
   0x9   :  { %701 = vmatmul.msk.f32.vlgmr.msra.gmra.mxu0 %vm33_vm0, %v26_v4  ;;  %196 = vmatpush.msra.mxu2 %v29_v3 }
   0xa   :  { %266 = vmatpush.msra.mxu3 %v29_v3  ;;  %333 = vmatpush.msrb.mxu0 %v32_v0 }
   0xb   :  { %403 = vmatpush.msrb.mxu1 %v32_v0  ;;  %473 = vmatpush.msrb.mxu2 %v32_v0 }
   0xc   :  { %334 = vmatpush.msrb.mxu0 %v31_v1  ;;  %543 = vmatpush.msrb.mxu3 %v32_v0 }
   0xd   :  { %404 = vmatpush.msrb.mxu1 %v31_v1  ;;  %474 = vmatpush.msrb.mxu2 %v31_v1 }
   0xe   :  { %335 = vmatpush.msrb.mxu0 %v30_v2  ;;  %544 = vmatpush.msrb.mxu3 %v31_v1 }
   0xf   :  { %405 = vmatpush.msrb.mxu1 %v30_v2  ;;  %475 = vmatpush.msrb.mxu2 %v30_v2 }
  0x10   :  { %336 = vmatpush.msrb.mxu0 %v29_v3  ;;  %545 = vmatpush.msrb.mxu3 %v30_v2 }
  0x11   :  { %406 = vmatpush.msrb.mxu1 %v29_v3  ;;  %476 = vmatpush.msrb.mxu2 %v29_v3 }
  0x12   :  { %546 = vmatpush.msrb.mxu3 %v29_v3 }
  0x86   :  { %v54_v6 = vpop.f32.mrf.mxu0 }
  0x87   :  { %v57_v7 = vadd.f32 %v54_v6, %v28_v5 }
  0x89   :  { %741 = vtanh.f32 %v57_v7  ;;  %v702_v10 = vmul.f32 -1.442695, %v57_v7 }
  0x8b   :  { %743 = vpow2.f32 %v702_v10 }
  0x8f   :  { %v742_v8 = vpop.eup %741 }
  0x90   :  { %84 = vrot.lane.b32.xlu0 %v742_v8, %s805_s15 }
  0x91   :  { %v744_v11 = vpop.eup %743 }
  0x92   :  { %v61_v12 = vadd.f32 1.0, %v744_v11 }
  0x94   :  { %745 = vrcp.f32 %v61_v12  ;;  %v73_v18 = vand.u32 2147483648, %v61_v12  ;;  %vm67_vm2 = vweird.f32 %v61_v12  ;;  %v71_v19 = vand.u32 2147483647, %v61_v12 }
  0x96   :  { %v74_v21 = vor.u32 1.1754944e-38, %v73_v18  ;;  %vm72_vm4 = vcmp.eq.f32.partialorder %v71_v19, 8.507059e+37 }
  0x98   :  { %79 = vrot.lane.b32.xlu0 %v27_v9, %s806_s18 }
  0x9a   :  { %v746_v13 = vpop.eup %745 }
  0x9b   :  { %v63_v14 = vmul.f32 %v746_v13, %v61_v12  ;;  %vm68_vm1 = vweird.f32 %v746_v13 }
  0x9c   :  { %vm69_vm3 = vmor %vm67_vm2, %vm68_vm1 }
  0x9d   :  { %v64_v15 = vsub.f32 1.0, %v63_v14 }
  0x9f   :  { %v65_v16 = vmul.f32 %v746_v13, %v64_v15 }
  0xa1   :  { %v66_v17 = vadd.f32 %v746_v13, %v65_v16 }
  0xa3   :  { %v70_v20 = vsel %vm69_vm3, %v746_v13, %v66_v17 }
  0xa4   :  { %v75_v23 = vsel %vm72_vm4, %v74_v21, %v70_v20  ;;  %v244_v21 = vld [vmem:[%s1015_s0 + $0x18] sm:$0xff] }
 0x102   :  { %v85_v22 = vpop.permute.xlu0 %84 }
 0x103   :  { %v87_v24 = vmul.f32 %v85_v22, %v75_v23 }
 0x105   :  { %89 = vrot.lane.b32.xlu1 %v87_v24, %s806_s18 }
 0x10a   :  { %v80_v25 = vpop.permute.xlu0 %79 }
 0x10b   :  { %v82_v26 = vmul.f32 %v80_v25, %v75_v23 }
 0x177   :  { %v90_v27 = vpop.permute.xlu1 %89 }
 0x178   :  { %v92_v28 = vadd.f32 %v90_v27, %v82_v26 }
 0x17a   :  { %747 = vtanh.f32 %v92_v28 }
 0x180   :  { %v748_v29 = vpop.eup %747 }
 0x181   :  { %95 = vrot.lane.b32.xlu1 %v748_v29, %s805_s15 }
 0x1f3   :  { %v96_v30 = vpop.permute.xlu1 %95 }
 0x1f4   :  { %v98_v31 = vmul.f32 %v96_v30, %v75_v23 }
 0x1f6   :  { %100 = vrot.lane.b32.xlu2 %v98_v31, %s806_s18 }
 0x250   :  { %v101_v32 = vpop.permute.xlu2 %100 }
 0x251   :  { %103 = vst.msk [vmem:[#allocation2] sm:$0xff] %vm33_vm0, %v101_v32  ;;  %703 = vmatmul.msk.f32.vlgmr.msra.gmra.mxu1 %vm33_vm0, %v101_v32 }
 0x2ce   :  { %v128_v34 = vpop.f32.mrf.mxu1 }
 0x2cf   :  { %v131_v35 = vadd.f32 %v128_v34, %v104_v33 }
 0x2d1   :  { %749 = vtanh.f32 %v131_v35  ;;  %v704_v37 = vmul.f32 -1.442695, %v131_v35 }
 0x2d3   :  { %751 = vpow2.f32 %v704_v37 }
 0x2d7   :  { %v750_v36 = vpop.eup %749 }
 0x2d8   :  { %154 = vrot.lane.b32.xlu2 %v750_v36, %s805_s15 }
 0x2d9   :  { %v752_v38 = vpop.eup %751 }
 0x2da   :  { %v135_v39 = vadd.f32 1.0, %v752_v38 }
 0x2dc   :  { %753 = vrcp.f32 %v135_v39  ;;  %v147_v45 = vand.u32 2147483648, %v135_v39  ;;  %vm141_vm6 = vweird.f32 %v135_v39  ;;  %v145_v46 = vand.u32 2147483647, %v135_v39 }
 0x2de   :  { %v148_v48 = vor.u32 1.1754944e-38, %v147_v45  ;;  %vm146_vm8 = vcmp.eq.f32.partialorder %v145_v46, 8.507059e+37  ;;  %v611_v46 = vld [vmem:[%s1017_s4 + $0x18] sm:$0xff] }
 0x2df   :  { %652 = vmatpush.msra.mxu0 %v611_v46  ;;  %725 = vmatpush.msra.mxu1 %v611_v46 }
 0x2e2   :  { %v754_v40 = vpop.eup %753 }
 0x2e3   :  { %v137_v41 = vmul.f32 %v754_v40, %v135_v39  ;;  %vm142_vm5 = vweird.f32 %v754_v40 }
 0x2e4   :  { %vm143_vm7 = vmor %vm141_vm6, %vm142_vm5 }
 0x2e5   :  { %v138_v42 = vsub.f32 1.0, %v137_v41 }
 0x2e7   :  { %v139_v43 = vmul.f32 %v754_v40, %v138_v42 }
 0x2e9   :  { %v140_v44 = vadd.f32 %v754_v40, %v139_v43 }
 0x2eb   :  { %v144_v47 = vsel %vm143_vm7, %v754_v40, %v140_v44 }
 0x2ec   :  { %v149_v50 = vsel %vm146_vm8, %v148_v48, %v144_v47  ;;  %v610_v47 = vld [vmem:[%s1017_s4 + $0x10] sm:$0xff]  ;;  %v609_v48 = vld [vmem:[%s1017_s4 + $0x8] sm:$0xff] }
 0x2ed   :  { %v152_v52 = vmul.f32 %v149_v50, %v92_v28  ;;  %653 = vmatpush.msra.mxu0 %v610_v47  ;;  %728 = vmatpush.msra.mxu1 %v610_v47 }
 0x2ef   :  { %654 = vmatpush.msra.mxu0 %v609_v48  ;;  %731 = vmatpush.msra.mxu1 %v609_v48 }
 0x332   :  { %v155_v49 = vpop.permute.xlu2 %154 }
 0x333   :  { %v157_v51 = vmul.f32 %v155_v49, %v149_v50  ;;  %v608_v49 = vld [vmem:[%s1017_s4] sm:$0xff] }
 0x334   :  { %655 = vmatpush.msra.mxu0 %v608_v49  ;;  %734 = vmatpush.msra.mxu1 %v608_v49 }
 0x335   :  { %159 = vrot.lane.b32.xlu0 %v157_v51, %s806_s18  ;;  %v600_v51 = vld [vmem:[#allocation2] sm:$0xff] }
 0x3a7   :  { %v160_v53 = vpop.permute.xlu0 %159 }
 0x3a8   :  { %v162_v54 = vadd.f32 %v160_v53, %v152_v52  ;;  %v314_v53 = vld [vmem:[%s1015_s0 + $0x20] sm:$0xff] }
 0x3aa   :  { %755 = vtanh.f32 %v162_v54 }
 0x3b0   :  { %v756_v55 = vpop.eup %755 }
 0x3b1   :  { %165 = vrot.lane.b32.xlu1 %v756_v55, %s805_s15 }
 0x423   :  { %v166_v56 = vpop.permute.xlu1 %165 }
 0x424   :  { %v168_v57 = vmul.f32 %v166_v56, %v149_v50  ;;  %v932_v56 = vld [vmem:[%s1018_s5] ss:$0 sm:$0xff] }
 0x426   :  { %170 = vrot.lane.b32.xlu2 %v168_v57, %s806_s18 }
 0x480   :  { %v171_v58 = vpop.permute.xlu2 %170 }
 0x481   :  { %173 = vst.msk [vmem:[#allocation2 + $0x8] sm:$0xff] %vm33_vm0, %v171_v58  ;;  %705 = vmatmul.msk.f32.vlgmr.msra.gmra.mxu2 %vm33_vm0, %v171_v58 }
 0x482   :  { %726 = vmatpush.msra.mxu2 %v611_v46 }
 0x484   :  { %729 = vmatpush.msra.mxu2 %v610_v47 }
 0x486   :  { %732 = vmatpush.msra.mxu2 %v609_v48 }
 0x488   :  { %735 = vmatpush.msra.mxu2 %v608_v49  ;;  %v601_v52 = vld [vmem:[#allocation2 + $0x8] sm:$0xff] }
 0x504   :  { %v198_v60 = vpop.f32.mrf.mxu2 }
 0x505   :  { %v201_v61 = vadd.f32 %v198_v60, %v174_v59 }
 0x507   :  { %757 = vtanh.f32 %v201_v61  ;;  %v706_v63 = vmul.f32 -1.442695, %v201_v61 }
 0x509   :  { %759 = vpow2.f32 %v706_v63 }
 0x50d   :  { %v758_v62 = vpop.eup %757 }
 0x50e   :  { %224 = vrot.lane.b32.xlu0 %v758_v62, %s805_s15 }
 0x50f   :  { %v760_v0 = vpop.eup %759 }
 0x510   :  { %v205_v1 = vadd.f32 1.0, %v760_v0 }
 0x512   :  { %761 = vrcp.f32 %v205_v1  ;;  %v217_v7 = vand.u32 2147483648, %v205_v1  ;;  %vm211_vm10 = vweird.f32 %v205_v1  ;;  %v215_v8 = vand.u32 2147483647, %v205_v1 }
 0x514   :  { %v218_v10 = vor.u32 1.1754944e-38, %v217_v7  ;;  %vm216_vm12 = vcmp.eq.f32.partialorder %v215_v8, 8.507059e+37 }
 0x518   :  { %v762_v2 = vpop.eup %761 }
 0x519   :  { %v207_v3 = vmul.f32 %v762_v2, %v205_v1  ;;  %vm212_vm9 = vweird.f32 %v762_v2 }
 0x51a   :  { %vm213_vm11 = vmor %vm211_vm10, %vm212_vm9 }
 0x51b   :  { %v208_v4 = vsub.f32 1.0, %v207_v3 }
 0x51d   :  { %v209_v5 = vmul.f32 %v762_v2, %v208_v4 }
 0x51f   :  { %v210_v6 = vadd.f32 %v762_v2, %v209_v5 }
 0x521   :  { %v214_v9 = vsel %vm213_vm11, %v762_v2, %v210_v6 }
 0x522   :  { %v219_v12 = vsel %vm216_vm12, %v218_v10, %v214_v9 }
 0x523   :  { %v222_v14 = vmul.f32 %v219_v12, %v162_v54 }
 0x580   :  { %v225_v11 = vpop.permute.xlu0 %224 }
 0x581   :  { %v227_v13 = vmul.f32 %v225_v11, %v219_v12 }
 0x583   :  { %229 = vrot.lane.b32.xlu1 %v227_v13, %s806_s18 }
 0x5f5   :  { %v230_v15 = vpop.permute.xlu1 %229 }
 0x5f6   :  { %v232_v16 = vadd.f32 %v230_v15, %v222_v14 }
 0x5f8   :  { %763 = vtanh.f32 %v232_v16 }
 0x5fe   :  { %v764_v17 = vpop.eup %763 }
 0x5ff   :  { %235 = vrot.lane.b32.xlu2 %v764_v17, %s805_s15 }
 0x659   :  { %v236_v18 = vpop.permute.xlu2 %235 }
 0x65a   :  { %v238_v19 = vmul.f32 %v236_v18, %v219_v12 }
 0x65c   :  { %240 = vrot.lane.b32.xlu0 %v238_v19, %s806_s18 }
 0x6ce   :  { %v241_v20 = vpop.permute.xlu0 %240 }
 0x6cf   :  { %243 = vst.msk [vmem:[#allocation2 + $0x10] sm:$0xff] %vm33_vm0, %v241_v20  ;;  %707 = vmatmul.msk.f32.vlgmr.msra.gmra.mxu3 %vm33_vm0, %v241_v20 }
 0x6d0   :  { %727 = vmatpush.msra.mxu3 %v611_v46 }
 0x6d2   :  { %730 = vmatpush.msra.mxu3 %v610_v47 }
 0x6d4   :  { %733 = vmatpush.msra.mxu3 %v609_v48 }
 0x6d6   :  { %736 = vmatpush.msra.mxu3 %v608_v49  ;;  %v602_v20 = vld [vmem:[#allocation2 + $0x10] sm:$0xff] }
 0x752   :  { %v268_v22 = vpop.f32.mrf.mxu3 }
 0x753   :  { %v271_v23 = vadd.f32 %v268_v22, %v244_v21  ;;  %v384_v22 = vld [vmem:[%s1015_s0 + $0x28] sm:$0xff] }
 0x755   :  { %765 = vtanh.f32 %v271_v23  ;;  %v708_v25 = vmul.f32 -1.442695, %v271_v23 }
 0x757   :  { %767 = vpow2.f32 %v708_v25 }
 0x75b   :  { %v766_v24 = vpop.eup %765 }
 0x75c   :  { %294 = vrot.lane.b32.xlu1 %v766_v24, %s805_s15 }
 0x75d   :  { %v768_v26 = vpop.eup %767 }
 0x75e   :  { %v275_v27 = vadd.f32 1.0, %v768_v26 }
 0x760   :  { %769 = vrcp.f32 %v275_v27  ;;  %v287_v33 = vand.u32 2147483648, %v275_v27  ;;  %vm281_vm14 = vweird.f32 %v275_v27  ;;  %v285_v34 = vand.u32 2147483647, %v275_v27 }
 0x762   :  { %v288_v36 = vor.u32 1.1754944e-38, %v287_v33  ;;  %vm286_vm1 = vcmp.eq.f32.partialorder %v285_v34, 8.507059e+37 }
 0x766   :  { %v770_v28 = vpop.eup %769 }
 0x767   :  { %v277_v29 = vmul.f32 %v770_v28, %v275_v27  ;;  %vm282_vm13 = vweird.f32 %v770_v28 }
 0x768   :  { %vm283_vm15 = vmor %vm281_vm14, %vm282_vm13 }
 0x769   :  { %v278_v30 = vsub.f32 1.0, %v277_v29 }
 0x76b   :  { %v279_v31 = vmul.f32 %v770_v28, %v278_v30 }
 0x76d   :  { %v280_v32 = vadd.f32 %v770_v28, %v279_v31 }
 0x76f   :  { %v284_v35 = vsel %vm283_vm15, %v770_v28, %v280_v32 }
 0x770   :  { %v289_v38 = vsel %vm286_vm1, %v288_v36, %v284_v35 }
 0x771   :  { %v292_v40 = vmul.f32 %v289_v38, %v232_v16 }
 0x7ce   :  { %v295_v37 = vpop.permute.xlu1 %294 }
 0x7cf   :  { %v297_v39 = vmul.f32 %v295_v37, %v289_v38 }
 0x7d1   :  { %299 = vrot.lane.b32.xlu2 %v297_v39, %s806_s18 }
 0x82b   :  { %v300_v41 = vpop.permute.xlu2 %299 }
 0x82c   :  { %v905_v42 = vadd.f32 %v300_v41, %v292_v40 }
 0x82e   :  { %771 = vtanh.f32 %v905_v42 }
 0x834   :  { %v772_v43 = vpop.eup %771 }
 0x835   :  { %305 = vrot.lane.b32.xlu0 %v772_v43, %s805_s15 }
 0x8a7   :  { %v306_v44 = vpop.permute.xlu0 %305 }
 0x8a8   :  { %v308_v45 = vmul.f32 %v306_v44, %v289_v38 }
 0x8aa   :  { %310 = vrot.lane.b32.xlu1 %v308_v45, %s806_s18 }
 0x91c   :  { %v311_v50 = vpop.permute.xlu1 %310 }
 0x91d   :  { %313 = vst.msk [vmem:[#allocation2 + $0x18] sm:$0xff] %vm33_vm0, %v311_v50  ;;  %709 = vmatmul.msk.f32.vlgmr.msrb.gmra.mxu0 %vm33_vm0, %v311_v50 }
 0x924   :  { %v603_v21 = vld [vmem:[#allocation2 + $0x18] sm:$0xff] }
 0x925   :  { %717 = vmatmul.msk.f32.vlgmr.msra.gmra.mxu0 %vm33_vm0, %v600_v51 }
 0x92d   :  { %718 = vmatmul.msk.f32.gmra.mxu0 %vm33_vm0, %v601_v52 }
 0x99a   :  { %v338_v54 = vpop.f32.mrf.mxu0 }
 0x99b   :  { %v341_v55 = vadd.f32 %v338_v54, %v314_v53  ;;  %v454_v54 = vld [vmem:[%s1015_s0 + $0x30] sm:$0xff] }
 0x99d   :  { %773 = vtanh.f32 %v341_v55  ;;  %v710_v62 = vmul.f32 -1.442695, %v341_v55 }
 0x99f   :  { %775 = vpow2.f32 %v710_v62 }
 0x9a2   :  { %v657_v57 = vpop.f32.mrf.mxu0 }
 0x9a3   :  { %v774_v58 = vpop.eup %773  ;;  %v658_v59 = vadd.f32 %v932_v56, %v657_v57 }
 0x9a4   :  { %364 = vrot.lane.b32.xlu2 %v774_v58, %s805_s15 }
 0x9a5   :  { %681 = vst [vmem:[%s1019_s6] sm:$0xff] %v658_v59  ;;  %v776_v63 = vpop.eup %775 }
 0x9a6   :  { %v345_v0 = vadd.f32 1.0, %v776_v63 }
 0x9a8   :  { %777 = vrcp.f32 %v345_v0  ;;  %v357_v6 = vand.u32 2147483648, %v345_v0  ;;  %vm351_vm3 = vweird.f32 %v345_v0  ;;  %v355_v7 = vand.u32 2147483647, %v345_v0 }
 0x9aa   :  { %v660_v60 = vpop.f32.mrf.mxu0  ;;  %v358_v9 = vor.u32 1.1754944e-38, %v357_v6  ;;  %vm356_vm5 = vcmp.eq.f32.partialorder %v355_v7, 8.507059e+37 }
 0x9ab   :  { %v661_v61 = vadd.f32 %v932_v56, %v660_v60 }
 0x9ad   :  { %682 = vst [vmem:[%s1019_s6 + $0x8] sm:$0xff] %v661_v61 }
 0x9ae   :  { %v778_v1 = vpop.eup %777 }
 0x9af   :  { %v347_v2 = vmul.f32 %v778_v1, %v345_v0  ;;  %vm352_vm2 = vweird.f32 %v778_v1 }
 0x9b0   :  { %vm353_vm4 = vmor %vm351_vm3, %vm352_vm2 }
 0x9b1   :  { %v348_v3 = vsub.f32 1.0, %v347_v2 }
 0x9b3   :  { %v349_v4 = vmul.f32 %v778_v1, %v348_v3 }
 0x9b5   :  { %v350_v5 = vadd.f32 %v778_v1, %v349_v4 }
 0x9b7   :  { %v354_v8 = vsel %vm353_vm4, %v778_v1, %v350_v5 }
 0x9b8   :  { %v359_v11 = vsel %vm356_vm5, %v358_v9, %v354_v8 }
 0x9b9   :  { %v362_v13 = vmul.f32 %v359_v11, %v905_v42 }
 0x9fe   :  { %v365_v10 = vpop.permute.xlu2 %364 }
 0x9ff   :  { %v367_v12 = vmul.f32 %v365_v10, %v359_v11 }
 0xa01   :  { %369 = vrot.lane.b32.xlu0 %v367_v12, %s806_s18 }
 0xa73   :  { %v370_v14 = vpop.permute.xlu0 %369 }
 0xa74   :  { %v372_v15 = vadd.f32 %v370_v14, %v362_v13 }
 0xa76   :  { %779 = vtanh.f32 %v372_v15 }
 0xa7c   :  { %v780_v16 = vpop.eup %779 }
 0xa7d   :  { %375 = vrot.lane.b32.xlu1 %v780_v16, %s805_s15 }
 0xaef   :  { %v376_v17 = vpop.permute.xlu1 %375 }
 0xaf0   :  { %v378_v18 = vmul.f32 %v376_v17, %v359_v11 }
 0xaf2   :  { %380 = vrot.lane.b32.xlu2 %v378_v18, %s806_s18 }
 0xb4c   :  { %v381_v19 = vpop.permute.xlu2 %380 }
 0xb4d   :  { %383 = vst.msk [vmem:[#allocation2 + $0x20] sm:$0xff] %vm33_vm0, %v381_v19  ;;  %711 = vmatmul.msk.f32.vlgmr.msrb.gmra.mxu1 %vm33_vm0, %v381_v19 }
 0xb54   :  { %v604_v52 = vld [vmem:[#allocation2 + $0x20] sm:$0xff] }
 0xb55   :  { %719 = vmatmul.msk.f32.vlgmr.msra.gmra.mxu1 %vm33_vm0, %v602_v20 }
 0xb5d   :  { %720 = vmatmul.msk.f32.gmra.mxu1 %vm33_vm0, %v603_v21 }
 0xbca   :  { %v408_v23 = vpop.f32.mrf.mxu1 }
 0xbcb   :  { %v411_v24 = vadd.f32 %v408_v23, %v384_v22  ;;  %v524_v22 = vld [vmem:[%s1015_s0 + $0x38] sm:$0xff]  ;;  %s807_s0 = smov 96  }
 0xbcd   :  { %781 = vtanh.f32 %v411_v24  ;;  %v712_v30 = vmul.f32 -1.442695, %v411_v24 }
 0xbcf   :  { %783 = vpow2.f32 %v712_v30 }
 0xbd2   :  { %v663_v25 = vpop.f32.mrf.mxu1 }
 0xbd3   :  { %v782_v26 = vpop.eup %781  ;;  %v664_v27 = vadd.f32 %v932_v56, %v663_v25 }
 0xbd4   :  { %434 = vrot.lane.b32.xlu0 %v782_v26, %s805_s15 }
 0xbd5   :  { %683 = vst [vmem:[%s1019_s6 + $0x10] sm:$0xff] %v664_v27  ;;  %v784_v31 = vpop.eup %783 }
 0xbd6   :  { %v415_v32 = vadd.f32 1.0, %v784_v31 }
 0xbd8   :  { %785 = vrcp.f32 %v415_v32  ;;  %v427_v38 = vand.u32 2147483648, %v415_v32  ;;  %vm421_vm7 = vweird.f32 %v415_v32  ;;  %v425_v39 = vand.u32 2147483647, %v415_v32 }
 0xbda   :  { %v666_v28 = vpop.f32.mrf.mxu1  ;;  %v428_v41 = vor.u32 1.1754944e-38, %v427_v38  ;;  %vm426_vm9 = vcmp.eq.f32.partialorder %v425_v39, 8.507059e+37 }
 0xbdb   :  { %v667_v29 = vadd.f32 %v932_v56, %v666_v28 }
 0xbdd   :  { %684 = vst [vmem:[%s1019_s6 + $0x18] sm:$0xff] %v667_v29 }
 0xbde   :  { %v786_v33 = vpop.eup %785 }
 0xbdf   :  { %v417_v34 = vmul.f32 %v786_v33, %v415_v32  ;;  %vm422_vm6 = vweird.f32 %v786_v33 }
 0xbe0   :  { %vm423_vm8 = vmor %vm421_vm7, %vm422_vm6 }
 0xbe1   :  { %v418_v35 = vsub.f32 1.0, %v417_v34 }
 0xbe3   :  { %v419_v36 = vmul.f32 %v786_v33, %v418_v35 }
 0xbe5   :  { %v420_v37 = vadd.f32 %v786_v33, %v419_v36 }
 0xbe7   :  { %v424_v40 = vsel %vm423_vm8, %v786_v33, %v420_v37 }
 0xbe8   :  { %v429_v43 = vsel %vm426_vm9, %v428_v41, %v424_v40 }
 0xbe9   :  { %v432_v45 = vmul.f32 %v429_v43, %v372_v15 }
 0xc46   :  { %v435_v42 = vpop.permute.xlu0 %434 }
 0xc47   :  { %v437_v44 = vmul.f32 %v435_v42, %v429_v43 }
 0xc49   :  { %439 = vrot.lane.b32.xlu1 %v437_v44, %s806_s18 }
 0xcbb   :  { %v440_v46 = vpop.permute.xlu1 %439 }
 0xcbc   :  { %v442_v47 = vadd.f32 %v440_v46, %v432_v45 }
 0xcbe   :  { %787 = vtanh.f32 %v442_v47 }
 0xcc4   :  { %v788_v48 = vpop.eup %787 }
 0xcc5   :  { %445 = vrot.lane.b32.xlu2 %v788_v48, %s805_s15 }
 0xd1f   :  { %v446_v49 = vpop.permute.xlu2 %445 }
 0xd20   :  { %v448_v50 = vmul.f32 %v446_v49, %v429_v43 }
 0xd22   :  { %450 = vrot.lane.b32.xlu0 %v448_v50, %s806_s18 }
 0xd94   :  { %v451_v51 = vpop.permute.xlu0 %450 }
 0xd95   :  { %453 = vst.msk [vmem:[#allocation2 + $0x28] sm:$0xff] %vm33_vm0, %v451_v51  ;;  %713 = vmatmul.msk.f32.vlgmr.msrb.gmra.mxu2 %vm33_vm0, %v451_v51 }
 0xd9c   :  { %v605_v53 = vld [vmem:[#allocation2 + $0x28] sm:$0xff] }
 0xd9d   :  { %721 = vmatmul.msk.f32.vlgmr.msra.gmra.mxu2 %vm33_vm0, %v604_v52 }
 0xda5   :  { %722 = vmatmul.msk.f32.gmra.mxu2 %vm33_vm0, %v605_v53 }
 0xe18   :  { %v478_v55 = vpop.f32.mrf.mxu2 }
 0xe19   :  { %v481_v57 = vadd.f32 %v478_v55, %v454_v54 }
 0xe1b   :  { %789 = vtanh.f32 %v481_v57  ;;  %v714_v63 = vmul.f32 -1.442695, %v481_v57 }
 0xe1d   :  { %791 = vpow2.f32 %v714_v63 }
 0xe20   :  { %v669_v58 = vpop.f32.mrf.mxu2 }
 0xe21   :  { %v790_v59 = vpop.eup %789  ;;  %v670_v60 = vadd.f32 %v932_v56, %v669_v58 }
 0xe22   :  { %504 = vrot.lane.b32.xlu1 %v790_v59, %s805_s15 }
 0xe23   :  { %685 = vst [vmem:[%s1019_s6 + $0x20] sm:$0xff] %v670_v60  ;;  %v792_v0 = vpop.eup %791 }
 0xe24   :  { %v485_v1 = vadd.f32 1.0, %v792_v0 }
 0xe26   :  { %793 = vrcp.f32 %v485_v1  ;;  %v497_v7 = vand.u32 2147483648, %v485_v1  ;;  %vm491_vm11 = vweird.f32 %v485_v1  ;;  %v495_v8 = vand.u32 2147483647, %v485_v1 }
 0xe28   :  { %v672_v61 = vpop.f32.mrf.mxu2  ;;  %v498_v10 = vor.u32 1.1754944e-38, %v497_v7  ;;  %vm496_vm13 = vcmp.eq.f32.partialorder %v495_v8, 8.507059e+37 }
 0xe29   :  { %v673_v62 = vadd.f32 %v932_v56, %v672_v61 }
 0xe2b   :  { %686 = vst [vmem:[%s1019_s6 + $0x28] sm:$0xff] %v673_v62 }
 0xe2c   :  { %v794_v2 = vpop.eup %793 }
 0xe2d   :  { %v487_v3 = vmul.f32 %v794_v2, %v485_v1  ;;  %vm492_vm10 = vweird.f32 %v794_v2 }
 0xe2e   :  { %vm493_vm12 = vmor %vm491_vm11, %vm492_vm10 }
 0xe2f   :  { %v488_v4 = vsub.f32 1.0, %v487_v3 }
 0xe31   :  { %v489_v5 = vmul.f32 %v794_v2, %v488_v4 }
 0xe33   :  { %v490_v6 = vadd.f32 %v794_v2, %v489_v5 }
 0xe35   :  { %v494_v9 = vsel %vm493_vm12, %v794_v2, %v490_v6 }
 0xe36   :  { %v499_v12 = vsel %vm496_vm13, %v498_v10, %v494_v9 }
 0xe37   :  { %v502_v14 = vmul.f32 %v499_v12, %v442_v47 }
 0xe94   :  { %v505_v11 = vpop.permute.xlu1 %504 }
 0xe95   :  { %v507_v13 = vmul.f32 %v505_v11, %v499_v12 }
 0xe97   :  { %509 = vrot.lane.b32.xlu2 %v507_v13, %s806_s18 }
 0xef1   :  { %v510_v15 = vpop.permute.xlu2 %509 }
 0xef2   :  { %v512_v16 = vadd.f32 %v510_v15, %v502_v14 }
 0xef4   :  { %795 = vtanh.f32 %v512_v16 }
 0xefa   :  { %v796_v17 = vpop.eup %795 }
 0xefb   :  { %515 = vrot.lane.b32.xlu0 %v796_v17, %s805_s15 }
 0xf6d   :  { %v516_v18 = vpop.permute.xlu0 %515 }
 0xf6e   :  { %v518_v19 = vmul.f32 %v516_v18, %v499_v12 }
 0xf70   :  { %520 = vrot.lane.b32.xlu1 %v518_v19, %s806_s18 }
 0xfe2   :  { %v521_v20 = vpop.permute.xlu1 %520 }
 0xfe3   :  { %523 = vst.msk [vmem:[#allocation2 + $0x30] sm:$0xff] %vm33_vm0, %v521_v20  ;;  %715 = vmatmul.msk.f32.vlgmr.msrb.gmra.mxu3 %vm33_vm0, %v521_v20 }
 0xfea   :  { %v606_v21 = vld [vmem:[#allocation2 + $0x30] sm:$0xff] }
 0xfeb   :  { %723 = vmatmul.msk.f32.vlgmr.msra.gmra.mxu3 %vm33_vm0, %v606_v21 }
0x1066   :  { %v548_v23 = vpop.f32.mrf.mxu3 }
0x1067   :  { %v551_v24 = vadd.f32 %v548_v23, %v524_v22 }
0x1069   :  { %797 = vtanh.f32 %v551_v24  ;;  %v716_v28 = vmul.f32 -1.442695, %v551_v24 }
0x106b   :  { %799 = vpow2.f32 %v716_v28 }
0x106e   :  { %v675_v25 = vpop.f32.mrf.mxu3 }
0x106f   :  { %v798_v26 = vpop.eup %797  ;;  %v676_v27 = vadd.f32 %v932_v56, %v675_v25 }
0x1070   :  { %574 = vrot.lane.b32.xlu2 %v798_v26, %s805_s15 }
0x1071   :  { %687 = vst [vmem:[%s1019_s6 + $0x30] sm:$0xff] %v676_v27  ;;  %v800_v29 = vpop.eup %799 }
0x1072   :  { %v555_v30 = vadd.f32 1.0, %v800_v29 }
0x1074   :  { %801 = vrcp.f32 %v555_v30  ;;  %v567_v36 = vand.u32 2147483648, %v555_v30  ;;  %vm561_vm15 = vweird.f32 %v555_v30  ;;  %v565_v37 = vand.u32 2147483647, %v555_v30 }
0x1076   :  { %v568_v39 = vor.u32 1.1754944e-38, %v567_v36  ;;  %vm566_vm2 = vcmp.eq.f32.partialorder %v565_v37, 8.507059e+37 }
0x107a   :  { %v802_v31 = vpop.eup %801 }
0x107b   :  { %v557_v32 = vmul.f32 %v802_v31, %v555_v30  ;;  %vm562_vm14 = vweird.f32 %v802_v31 }
0x107c   :  { %vm563_vm1 = vmor %vm561_vm15, %vm562_vm14 }
0x107d   :  { %v558_v33 = vsub.f32 1.0, %v557_v32 }
0x107f   :  { %v559_v34 = vmul.f32 %v802_v31, %v558_v33 }
0x1081   :  { %v560_v35 = vadd.f32 %v802_v31, %v559_v34 }
0x1083   :  { %v564_v38 = vsel %vm563_vm1, %v802_v31, %v560_v35 }
0x1084   :  { %v569_v41 = vsel %vm566_vm2, %v568_v39, %v564_v38 }
0x1085   :  { %v572_v43 = vmul.f32 %v569_v41, %v512_v16 }
0x10ca   :  { %v575_v40 = vpop.permute.xlu2 %574 }
0x10cb   :  { %v577_v42 = vmul.f32 %v575_v40, %v569_v41 }
0x10cd   :  { %579 = vrot.lane.b32.xlu0 %v577_v42, %s806_s18 }
0x113f   :  { %v580_v44 = vpop.permute.xlu0 %579 }
0x1140   :  { %v582_v45 = vadd.f32 %v580_v44, %v572_v43 }
0x1142   :  { %803 = vtanh.f32 %v582_v45  ;;  %596 = vrot.lane.b32.xlu0 %v582_v45, %s807_s0 }
0x1148   :  { %v804_v46 = vpop.eup %803 }
0x1149   :  { %585 = vrot.lane.b32.xlu1 %v804_v46, %s805_s15 }
0x11b4   :  { %v597_v47 = vpop.permute.xlu0 %596 }
0x11b5   :  { %599 = vst.msk [vmem:[%s1020_s8] sm:$0xff] %vm33_vm0, %v597_v47 }
0x11bb   :  { %v586_v48 = vpop.permute.xlu1 %585 }
0x11bc   :  { %v588_v49 = vmul.f32 %v586_v48, %v569_v41 }
0x11be   :  { %590 = vrot.lane.b32.xlu2 %v588_v49, %s806_s18 }
0x1218   :  { %v591_v50 = vpop.permute.xlu2 %590 }
0x1219   :  { %593 = vst.msk [vmem:[#allocation2 + $0x38] sm:$0xff] %vm33_vm0, %v591_v50 }
0x121a   :  { %594 = vst.msk [vmem:[%s1021_s7] sm:$0xff] %vm33_vm0, %v591_v50 }
0x1220   :  { %v607_v51 = vld [vmem:[#allocation2 + $0x38] sm:$0xff] }
0x1221   :  { %724 = vmatmul.msk.f32.gmra.mxu3 %vm33_vm0, %v607_v51 }
0x12a4   :  { %v678_v52 = vpop.f32.mrf.mxu3 }
0x12a5   :  { %v679_v53 = vadd.f32 %v932_v56, %v678_v52 }
0x12a7   :  { %688 = vst [vmem:[%s1019_s6 + $0x38] sm:$0xff] %v679_v53 }

</bundles_post_ra>
